<compile_context>
chip_gen: v6e
topology: v6e:2x2x1
jax: 0.10.0
libtpu: 0.0.40
codegen_flags: <defaults>
</compile_context>

<pallas_src>
import functools

import jax
import jax.numpy as jnp
import numpy as np
from jax.experimental import pallas as pl
from jax.experimental.pallas import tpu as pltpu

# Hyperparameters matching the PyTorch module
VOCAB_SIZE = 64
EMBED_DIM = 32      # embedding_dim
HIDDEN = 16         # hidden_size
NUM_LAYERS = 1      # single-layer LSTM (matches num_layers=1)


def lstm_kernel(T, BC, H, emb_ref, w_ih_t_ref, w_hh_t_ref, bias_ref,
                w_lin_t_ref, b_lin_ref, out_ref, xg_ref, hs_ref):
    """One batch-chunk of the fused LSTM (hoisted input/output projections).

    emb_ref:     (1, T*BC, E)  bf16, time-major rows (row = t*BC + b)
    w_ih_t_ref:  (E, 4H)       bf16   input->gates weights (pre-transposed)
    w_hh_t_ref:  (H, 4H)       f32    hidden->gates weights (pre-transposed)
    bias_ref:    (1, 4H)       f32    b_ih + b_hh
    w_lin_t_ref: (H, Vp)       bf16   output projection, lane-padded to Vp
    b_lin_ref:   (1, Vp)       f32
    out_ref:     (1, BC*T, Vp) f32, batch-major rows (row = b*T + t)
    xg_ref:      (T*BC, 4H)    f32 scratch: hoisted input projection
    hs_ref:      (T*BC, H)     f32 scratch: hidden-state history (time-major)
    """
    four_h = 4 * H

    # --- Pre-pass: input projection + fused bias for ALL timesteps in one ---
    # bf16 MXU call with f32 accumulation, off the serial path.
    xg_ref[...] = (jnp.dot(emb_ref[0], w_ih_t_ref[...],
                           preferred_element_type=jnp.float32)
                   + bias_ref[...])                               # (T*BC, 4H)

    w_hh_t = w_hh_t_ref[...]                                      # (H, 4H) resident

    # Hoisted lane constants for the single-tanh activation:
    #   i/f/o lanes: sigmoid(x) = 0.5*tanh(0.5*x) + 0.5 ;  g lanes: tanh(x).
    lane = jax.lax.broadcasted_iota(jnp.int32, (1, four_h), 1)
    is_g = jnp.logical_and(lane >= 2 * H, lane < 3 * H)
    scale = jnp.broadcast_to(jnp.where(is_g, 1.0, 0.5).astype(jnp.float32),
                             (BC, four_h))
    shift = jnp.broadcast_to(jnp.where(is_g, 0.0, 0.5).astype(jnp.float32),
                             (BC, four_h))

    # h0 = c0 = 0 (PyTorch default when no initial state is passed)
    h = jnp.zeros((BC, H), jnp.float32)
    c = jnp.zeros((BC, H), jnp.float32)

    # --- Serial recurrence: h/c carried in vregs, fully unrolled (static t) ---
    # TODO(synk): for large T switch to an outer fori_loop with a bounded
    # unroll factor (e.g. 8) to limit code size / vreg pressure.
    for t in range(T):
        rows = pl.ds(t * BC, BC)
        # (BC,H)x(H,4H) hidden matmul — the only MXU op left on the h->h chain.
        # TODO(synk): per review, at tiny BC the MXU fill/drain may dominate the
        # step; verify via bundle dump and consider H broadcast-FMAs on the VPU.
        gates = xg_ref[rows, :] + jnp.dot(h, w_hh_t,
                                          preferred_element_type=jnp.float32)
        # Single full-width tanh (one EUP pass) replaces tanh + sigmoid.
        act = jnp.tanh(gates * scale) * scale + shift             # (BC, 4H)
        # TODO(synk): gate extracts below are sub-128-lane rotates on the XLU
        # (shared vex slot with the MXU push); audit before restructuring.
        i_g = act[:, 0:H]
        f_g = act[:, H:2 * H]
        g_g = act[:, 2 * H:3 * H]
        o_g = act[:, 3 * H:4 * H]
        c = f_g * c + i_g * g_g
        h = o_g * jnp.tanh(c)
        hs_ref[rows, :] = h                # contiguous store, off the hot path

    # --- Post-pass: gather the hidden history batch-major (row b*T + t) with
    # strided reads, then one bf16 output projection and a single lane-dense
    # (BC*T, Vp) store -> logits leave the kernel already batch-major.
    hs_bm = jnp.concatenate(
        [hs_ref[pl.ds(b, T, stride=BC), :] for b in range(BC)], axis=0)
    out_ref[0] = (jnp.dot(hs_bm.astype(jnp.bfloat16), w_lin_t_ref[...],
                          preferred_element_type=jnp.float32)
                  + b_lin_ref[...])                               # (BC*T, Vp)


def _round_up(x, m):
    return ((x + m - 1) // m) * m


def prepare_params(params):
    """One-time parameter preconditioning (hoisted out of the per-call path)."""
    H = params["w_hh"].shape[1]
    V = params["w_lin"].shape[0]
    Vp = _round_up(V, 128)                                  # lane-dense logits width
    w_lin_t = jnp.zeros((H, Vp), jnp.float32).at[:, :V].set(params["w_lin"].T)
    b_lin_p = jnp.zeros((1, Vp), jnp.float32).at[:, :V].set(params["b_lin"])
    return {
        "embedding": params["embedding"],                          # (V, E) f32
        "w_ih_t": params["w_ih"].T.astype(jnp.bfloat16),           # (E, 4H)
        "w_hh_t": params["w_hh"].T.astype(jnp.float32),            # (H, 4H)
        "bias": (params["b_ih"] + params["b_hh"]).reshape(1, 4 * H),
        "w_lin_t": w_lin_t.astype(jnp.bfloat16),                   # (H, Vp)
        "b_lin": b_lin_p,                                          # (1, Vp)
    }


@jax.jit
def autoregressive_lstm_forward(x_tokens, prepped):
    """x_tokens: (B, T) int32 token ids -> logits (B, T, VOCAB) f32."""
    emb_table = prepped["embedding"]
    V, E = emb_table.shape
    H = prepped["w_hh_t"].shape[0]
    Vp = prepped["w_lin_t"].shape[1]
    B, T = x_tokens.shape

    # Batch padding / chunking: fill all 8 sublanes of every vreg and the MXU
    # rows; one "parallel" grid step per chunk so v7x's 2 TCs split the batch.
    # TODO(synk): for very large batches grow BC towards 128-256 and move the
    # in-kernel batch-major reorder to strided stores instead of a BC-way concat.
    Bp = _round_up(max(B, 8), 8)
    BC = min(Bp, 64)
    Bp = _round_up(Bp, BC)
    nc = Bp // BC

    # Embedding gather (data-dependent) stays in plain JAX glue; it is made
    # time-major by transposing only the tiny (B, T) int32 id array.
    # TODO(synk): no clean auto-tiled Pallas expression for the per-token gather.
    x_pad = jnp.zeros((Bp, T), jnp.int32).at[:B, :].set(x_tokens)
    emb = jnp.take(emb_table, x_pad.T, axis=0).astype(jnp.bfloat16)  # (T, Bp, E)
    emb_chunks = (emb.reshape(T, nc, BC, E)
                  .transpose(1, 0, 2, 3)
                  .reshape(nc, T * BC, E))        # no-op shuffle when nc == 1

    out = pl.pallas_call(
        functools.partial(lstm_kernel, T, BC, H),
        out_shape=jax.ShapeDtypeStruct((nc, BC * T, Vp), jnp.float32),
        grid=(nc,),
        in_specs=[
            pl.BlockSpec((1, T * BC, E), lambda i: (i, 0, 0)),   # emb chunk
            pl.BlockSpec((E, 4 * H), lambda i: (0, 0)),          # w_ih_t (bf16)
            pl.BlockSpec((H, 4 * H), lambda i: (0, 0)),          # w_hh_t (f32)
            pl.BlockSpec((1, 4 * H), lambda i: (0, 0)),          # fused bias
            pl.BlockSpec((H, Vp), lambda i: (0, 0)),             # w_lin_t (bf16)
            pl.BlockSpec((1, Vp), lambda i: (0, 0)),             # b_lin (padded)
        ],
        out_specs=pl.BlockSpec((1, BC * T, Vp), lambda i: (i, 0, 0)),
        scratch_shapes=[
            pltpu.VMEM((T * BC, 4 * H), jnp.float32),   # hoisted x-projection
            pltpu.VMEM((T * BC, H), jnp.float32),       # hidden-state history
        ],
        compiler_params=pltpu.CompilerParams(
            dimension_semantics=("parallel",),      # batch chunks -> 2 TCs on v7x
            vmem_limit_bytes=32 * 1024 * 1024,      # explicit: fits v7x's 64 MiB
        ),
    )(emb_chunks, prepped["w_ih_t"], prepped["w_hh_t"], prepped["bias"],
      prepped["w_lin_t"], prepped["b_lin"])

    # Output is already batch-major: reshape + slice padding, no transpose.
    return out.reshape(Bp, T, Vp)[:B, :, :V]


def reference_forward(x_tokens, params):
    """Pure-JAX f32 reference reproducing PyTorch LSTM semantics."""
    emb = jnp.take(params["embedding"], x_tokens, axis=0)  # (B, T, E)
    B, T, E = emb.shape
    H = params["w_hh"].shape[1]
    w_ih_t = params["w_ih"].T
    w_hh_t = params["w_hh"].T
    bias = params["b_ih"] + params["b_hh"]

    def step(carry, x_t):
        h, c = carry
        gates = x_t @ w_ih_t + h @ w_hh_t + bias
        i, f, g, o = jnp.split(gates, 4, axis=-1)
        i = jax.nn.sigmoid(i)
        f = jax.nn.sigmoid(f)
        g = jnp.tanh(g)
        o = jax.nn.sigmoid(o)
        c = f * c + i * g
        h = o * jnp.tanh(c)
        return (h, c), h

    h0 = jnp.zeros((B, H), jnp.float32)
    c0 = jnp.zeros((B, H), jnp.float32)
    _, hs = jax.lax.scan(step, (h0, c0), jnp.transpose(emb, (1, 0, 2)))
    hs = jnp.transpose(hs, (1, 0, 2))                       # (B, T, H)
    return hs @ params["w_lin"].T + params["b_lin"]         # (B, T, V)


if __name__ == "__main__":
    B, T = 2, 8
    key = jax.random.PRNGKey(0)
    keys = jax.random.split(key, 8)

    # Deterministic synthetic parameters (shapes per nn.Module __init__).
    params = {
        "embedding": 0.1 * jax.random.normal(keys[0], (VOCAB_SIZE, EMBED_DIM), jnp.float32),
        "w_ih": 0.1 * jax.random.normal(keys[1], (4 * HIDDEN, EMBED_DIM), jnp.float32),
        "w_hh": 0.1 * jax.random.normal(keys[2], (4 * HIDDEN, HIDDEN), jnp.float32),
        "b_ih": 0.1 * jax.random.normal(keys[3], (4 * HIDDEN,), jnp.float32),
        "b_hh": 0.1 * jax.random.normal(keys[4], (4 * HIDDEN,), jnp.float32),
        "w_lin": 0.1 * jax.random.normal(keys[5], (VOCAB_SIZE, HIDDEN), jnp.float32),
        "b_lin": 0.1 * jax.random.normal(keys[6], (VOCAB_SIZE,), jnp.float32),
    }
    x = jax.random.randint(keys[7], (B, T), 0, VOCAB_SIZE, dtype=jnp.int32)

    prepped = prepare_params(params)          # one-time, outside the hot path
    out = autoregressive_lstm_forward(x, prepped)
    out = jax.block_until_ready(out)
    assert out.shape == (B, T, VOCAB_SIZE) and out.dtype == jnp.float32

    ref = reference_forward(x, params)
    # bf16 bulk projections => slightly looser tolerance than a pure-f32 check.
    np.testing.assert_allclose(np.asarray(out), np.asarray(ref),
                               rtol=2e-2, atol=1e-2)
    print("KERNEL_OK")
</pallas_src>

<mosaic_0001>
module attributes {stable_mosaic.version = 11 : i64} {
  func.func @lstm_kernel(%arg0: i32, %arg1: memref<1x64x32xbf16, #tpu.memory_space<vmem>>, %arg2: memref<32x64xbf16, #tpu.memory_space<vmem>>, %arg3: memref<16x64xf32, #tpu.memory_space<vmem>>, %arg4: memref<1x64xf32, #tpu.memory_space<vmem>>, %arg5: memref<16x128xbf16, #tpu.memory_space<vmem>>, %arg6: memref<1x128xf32, #tpu.memory_space<vmem>>, %arg7: memref<1x64x128xf32, #tpu.memory_space<vmem>>, %arg8: memref<64x64xf32, #tpu.memory_space<vmem>>, %arg9: memref<64x16xf32, #tpu.memory_space<vmem>>) attributes {dimension_semantics = [#tpu.dimension_semantics<parallel>], iteration_bounds = array<i64: 1>, scalar_prefetch = 0 : i64, scratch_operands = 2 : i64, tpu.core_type = #tpu.core_type<tc>, window_params = [{transform_indices = @transform_0, window_bounds = array<i64: 1, 64, 32>}, {pipeline_mode = #tpu.pipeline_mode<synchronous>, transform_indices = @transform_1, window_bounds = array<i64: 32, 64>}, {pipeline_mode = #tpu.pipeline_mode<synchronous>, transform_indices = @transform_2, window_bounds = array<i64: 16, 64>}, {pipeline_mode = #tpu.pipeline_mode<synchronous>, transform_indices = @transform_3, window_bounds = array<i64: 1, 64>}, {pipeline_mode = #tpu.pipeline_mode<synchronous>, transform_indices = @transform_4, window_bounds = array<i64: 16, 128>}, {pipeline_mode = #tpu.pipeline_mode<synchronous>, transform_indices = @transform_5, window_bounds = array<i64: 1, 128>}, {transform_indices = @transform_6, window_bounds = array<i64: 1, 64, 128>}]} {
    %c0 = arith.constant 0 : index
    %c0_0 = arith.constant 0 : index
    %c0_1 = arith.constant 0 : index
    %0 = vector.load %arg1[%c0, %c0_0, %c0_1] : memref<1x64x32xbf16, #tpu.memory_space<vmem>>, vector<1x64x32xbf16>
    %1 = vector.shape_cast %0 : vector<1x64x32xbf16> to vector<64x32xbf16>
    %c0_2 = arith.constant 0 : index
    %c0_3 = arith.constant 0 : index
    %2 = vector.load %arg2[%c0_2, %c0_3] : memref<32x64xbf16, #tpu.memory_space<vmem>>, vector<32x64xbf16>
    %cst = arith.constant dense<0.000000e+00> : vector<64x64xf32>
    %3 = tpu.matmul %1, %2, %cst {dimension_numbers = #tpu.dot_dimension_numbers<[1], [0], [0], [1], [0, 0, 1, 1], [], []>} : vector<64x32xbf16>, vector<32x64xbf16>, vector<64x64xf32> -> vector<64x64xf32>
    %c0_4 = arith.constant 0 : index
    %c0_5 = arith.constant 0 : index
    %4 = vector.load %arg4[%c0_4, %c0_5] : memref<1x64xf32, #tpu.memory_space<vmem>>, vector<1x64xf32>
    %5 = vector.broadcast %4 : vector<1x64xf32> to vector<64x64xf32>
    %6 = arith.addf %3, %5 : vector<64x64xf32>
    %c0_6 = arith.constant 0 : index
    %c0_7 = arith.constant 0 : index
    %7 = vector.load %arg8[%c0_6, %c0_7] : memref<64x64xf32, #tpu.memory_space<vmem>>, vector<64x64xf32>
    tpu.vector_store %arg8[%c0_6, %c0_7], %6 {strides = array<i32>} : memref<64x64xf32, #tpu.memory_space<vmem>>, vector<64x64xf32>,
    %c0_8 = arith.constant 0 : index
    %c0_9 = arith.constant 0 : index
    %8 = vector.load %arg3[%c0_8, %c0_9] : memref<16x64xf32, #tpu.memory_space<vmem>>, vector<16x64xf32>
    %9 = tpu.iota {dimensions = array<i32: 1>} : vector<1x64xi32>
    %c32_i32 = arith.constant 32 : i32
    %10 = vector.broadcast %c32_i32 : i32 to vector<1x64xi32>
    %11 = arith.cmpi sge, %9, %10 : vector<1x64xi32>
    %c48_i32 = arith.constant 48 : i32
    %12 = vector.broadcast %c48_i32 : i32 to vector<1x64xi32>
    %13 = arith.cmpi slt, %9, %12 : vector<1x64xi32>
    %14 = arith.andi %11, %13 : vector<1x64xi1>
    %cst_10 = arith.constant 1.000000e+00 : f32
    %cst_11 = arith.constant 5.000000e-01 : f32
    %15 = vector.broadcast %cst_10 : f32 to vector<1x64xf32>
    %16 = vector.broadcast %cst_11 : f32 to vector<1x64xf32>
    %17 = arith.select %14, %15, %16 : vector<1x64xi1>, vector<1x64xf32>
    %18 = vector.shape_cast %17 : vector<1x64xf32> to vector<1x64xf32>
    %19 = vector.broadcast %18 : vector<1x64xf32> to vector<8x64xf32>
    %cst_12 = arith.constant 0.000000e+00 : f32
    %cst_13 = arith.constant 5.000000e-01 : f32
    %20 = vector.broadcast %cst_12 : f32 to vector<1x64xf32>
    %21 = vector.broadcast %cst_13 : f32 to vector<1x64xf32>
    %22 = arith.select %14, %20, %21 : vector<1x64xi1>, vector<1x64xf32>
    %23 = vector.shape_cast %22 : vector<1x64xf32> to vector<1x64xf32>
    %24 = vector.broadcast %23 : vector<1x64xf32> to vector<8x64xf32>
    %cst_14 = arith.constant 0.000000e+00 : f32
    %25 = vector.broadcast %cst_14 : f32 to vector<8x16xf32>
    %cst_15 = arith.constant 0.000000e+00 : f32
    %26 = vector.broadcast %cst_15 : f32 to vector<8x16xf32>
    %c0_16 = arith.constant 0 : index
    %c0_17 = arith.constant 0 : index
    %27 = vector.load %arg8[%c0_16, %c0_17] : memref<64x64xf32, #tpu.memory_space<vmem>>, vector<8x64xf32>
    %cst_18 = arith.constant dense<0.000000e+00> : vector<8x64xf32>
    %28 = tpu.matmul %25, %8, %cst_18 {dimension_numbers = #tpu.dot_dimension_numbers<[1], [0], [0], [1], [0, 0, 1, 1], [], []>} : vector<8x16xf32>, vector<16x64xf32>, vector<8x64xf32> -> vector<8x64xf32>
    %29 = arith.addf %27, %28 : vector<8x64xf32>
    %30 = arith.mulf %29, %19 : vector<8x64xf32>
    %31 = math.tanh %30 : vector<8x64xf32>
    %32 = arith.mulf %31, %19 : vector<8x64xf32>
    %33 = arith.addf %32, %24 : vector<8x64xf32>
    %34 = vector.extract_strided_slice %33 {offsets = [0, 0], sizes = [8, 16], strides = [1, 1]} : vector<8x64xf32> to vector<8x16xf32>
    %35 = vector.extract_strided_slice %33 {offsets = [0, 16], sizes = [8, 16], strides = [1, 1]} : vector<8x64xf32> to vector<8x16xf32>
    %36 = vector.extract_strided_slice %33 {offsets = [0, 32], sizes = [8, 16], strides = [1, 1]} : vector<8x64xf32> to vector<8x16xf32>
    %37 = vector.extract_strided_slice %33 {offsets = [0, 48], sizes = [8, 16], strides = [1, 1]} : vector<8x64xf32> to vector<8x16xf32>
    %38 = arith.mulf %35, %26 : vector<8x16xf32>
    %39 = arith.mulf %34, %36 : vector<8x16xf32>
    %40 = arith.addf %38, %39 : vector<8x16xf32>
    %41 = math.tanh %40 : vector<8x16xf32>
    %42 = arith.mulf %37, %41 : vector<8x16xf32>
    %c0_19 = arith.constant 0 : index
    %c0_20 = arith.constant 0 : index
    %43 = vector.load %arg9[%c0_19, %c0_20] : memref<64x16xf32, #tpu.memory_space<vmem>>, vector<8x16xf32>
    tpu.vector_store %arg9[%c0_19, %c0_20], %42 {strides = array<i32>} : memref<64x16xf32, #tpu.memory_space<vmem>>, vector<8x16xf32>,
    %c8 = arith.constant 8 : index
    %c0_21 = arith.constant 0 : index
    %44 = vector.load %arg8[%c8, %c0_21] : memref<64x64xf32, #tpu.memory_space<vmem>>, vector<8x64xf32>
    %cst_22 = arith.constant dense<0.000000e+00> : vector<8x64xf32>
    %45 = tpu.matmul %42, %8, %cst_22 {dimension_numbers = #tpu.dot_dimension_numbers<[1], [0], [0], [1], [0, 0, 1, 1], [], []>} : vector<8x16xf32>, vector<16x64xf32>, vector<8x64xf32> -> vector<8x64xf32>
    %46 = arith.addf %44, %45 : vector<8x64xf32>
    %47 = arith.mulf %46, %19 : vector<8x64xf32>
    %48 = math.tanh %47 : vector<8x64xf32>
    %49 = arith.mulf %48, %19 : vector<8x64xf32>
    %50 = arith.addf %49, %24 : vector<8x64xf32>
    %51 = vector.extract_strided_slice %50 {offsets = [0, 0], sizes = [8, 16], strides = [1, 1]} : vector<8x64xf32> to vector<8x16xf32>
    %52 = vector.extract_strided_slice %50 {offsets = [0, 16], sizes = [8, 16], strides = [1, 1]} : vector<8x64xf32> to vector<8x16xf32>
    %53 = vector.extract_strided_slice %50 {offsets = [0, 32], sizes = [8, 16], strides = [1, 1]} : vector<8x64xf32> to vector<8x16xf32>
    %54 = vector.extract_strided_slice %50 {offsets = [0, 48], sizes = [8, 16], strides = [1, 1]} : vector<8x64xf32> to vector<8x16xf32>
    %55 = arith.mulf %52, %40 : vector<8x16xf32>
    %56 = arith.mulf %51, %53 : vector<8x16xf32>
    %57 = arith.addf %55, %56 : vector<8x16xf32>
    %58 = math.tanh %57 : vector<8x16xf32>
    %59 = arith.mulf %54, %58 : vector<8x16xf32>
    %c8_23 = arith.constant 8 : index
    %c0_24 = arith.constant 0 : index
    %60 = vector.load %arg9[%c8_23, %c0_24] : memref<64x16xf32, #tpu.memory_space<vmem>>, vector<8x16xf32>
    tpu.vector_store %arg9[%c8_23, %c0_24], %59 {strides = array<i32>} : memref<64x16xf32, #tpu.memory_space<vmem>>, vector<8x16xf32>,
    %c16 = arith.constant 16 : index
    %c0_25 = arith.constant 0 : index
    %61 = vector.load %arg8[%c16, %c0_25] : memref<64x64xf32, #tpu.memory_space<vmem>>, vector<8x64xf32>
    %cst_26 = arith.constant dense<0.000000e+00> : vector<8x64xf32>
    %62 = tpu.matmul %59, %8, %cst_26 {dimension_numbers = #tpu.dot_dimension_numbers<[1], [0], [0], [1], [0, 0, 1, 1], [], []>} : vector<8x16xf32>, vector<16x64xf32>, vector<8x64xf32> -> vector<8x64xf32>
    %63 = arith.addf %61, %62 : vector<8x64xf32>
    %64 = arith.mulf %63, %19 : vector<8x64xf32>
    %65 = math.tanh %64 : vector<8x64xf32>
    %66 = arith.mulf %65, %19 : vector<8x64xf32>
    %67 = arith.addf %66, %24 : vector<8x64xf32>
    %68 = vector.extract_strided_slice %67 {offsets = [0, 0], sizes = [8, 16], strides = [1, 1]} : vector<8x64xf32> to vector<8x16xf32>
    %69 = vector.extract_strided_slice %67 {offsets = [0, 16], sizes = [8, 16], strides = [1, 1]} : vector<8x64xf32> to vector<8x16xf32>
    %70 = vector.extract_strided_slice %67 {offsets = [0, 32], sizes = [8, 16], strides = [1, 1]} : vector<8x64xf32> to vector<8x16xf32>
    %71 = vector.extract_strided_slice %67 {offsets = [0, 48], sizes = [8, 16], strides = [1, 1]} : vector<8x64xf32> to vector<8x16xf32>
    %72 = arith.mulf %69, %57 : vector<8x16xf32>
    %73 = arith.mulf %68, %70 : vector<8x16xf32>
    %74 = arith.addf %72, %73 : vector<8x16xf32>
    %75 = math.tanh %74 : vector<8x16xf32>
    %76 = arith.mulf %71, %75 : vector<8x16xf32>
    %c16_27 = arith.constant 16 : index
    %c0_28 = arith.constant 0 : index
    %77 = vector.load %arg9[%c16_27, %c0_28] : memref<64x16xf32, #tpu.memory_space<vmem>>, vector<8x16xf32>
    tpu.vector_store %arg9[%c16_27, %c0_28], %76 {strides = array<i32>} : memref<64x16xf32, #tpu.memory_space<vmem>>, vector<8x16xf32>,
    %c24 = arith.constant 24 : index
    %c0_29 = arith.constant 0 : index
    %78 = vector.load %arg8[%c24, %c0_29] : memref<64x64xf32, #tpu.memory_space<vmem>>, vector<8x64xf32>
    %cst_30 = arith.constant dense<0.000000e+00> : vector<8x64xf32>
    %79 = tpu.matmul %76, %8, %cst_30 {dimension_numbers = #tpu.dot_dimension_numbers<[1], [0], [0], [1], [0, 0, 1, 1], [], []>} : vector<8x16xf32>, vector<16x64xf32>, vector<8x64xf32> -> vector<8x64xf32>
    %80 = arith.addf %78, %79 : vector<8x64xf32>
    %81 = arith.mulf %80, %19 : vector<8x64xf32>
    %82 = math.tanh %81 : vector<8x64xf32>
    %83 = arith.mulf %82, %19 : vector<8x64xf32>
    %84 = arith.addf %83, %24 : vector<8x64xf32>
    %85 = vector.extract_strided_slice %84 {offsets = [0, 0], sizes = [8, 16], strides = [1, 1]} : vector<8x64xf32> to vector<8x16xf32>
    %86 = vector.extract_strided_slice %84 {offsets = [0, 16], sizes = [8, 16], strides = [1, 1]} : vector<8x64xf32> to vector<8x16xf32>
    %87 = vector.extract_strided_slice %84 {offsets = [0, 32], sizes = [8, 16], strides = [1, 1]} : vector<8x64xf32> to vector<8x16xf32>
    %88 = vector.extract_strided_slice %84 {offsets = [0, 48], sizes = [8, 16], strides = [1, 1]} : vector<8x64xf32> to vector<8x16xf32>
    %89 = arith.mulf %86, %74 : vector<8x16xf32>
    %90 = arith.mulf %85, %87 : vector<8x16xf32>
    %91 = arith.addf %89, %90 : vector<8x16xf32>
    %92 = math.tanh %91 : vector<8x16xf32>
    %93 = arith.mulf %88, %92 : vector<8x16xf32>
    %c24_31 = arith.constant 24 : index
    %c0_32 = arith.constant 0 : index
    %94 = vector.load %arg9[%c24_31, %c0_32] : memref<64x16xf32, #tpu.memory_space<vmem>>, vector<8x16xf32>
    tpu.vector_store %arg9[%c24_31, %c0_32], %93 {strides = array<i32>} : memref<64x16xf32, #tpu.memory_space<vmem>>, vector<8x16xf32>,
    %c32 = arith.constant 32 : index
    %c0_33 = arith.constant 0 : index
    %95 = vector.load %arg8[%c32, %c0_33] : memref<64x64xf32, #tpu.memory_space<vmem>>, vector<8x64xf32>
    %cst_34 = arith.constant dense<0.000000e+00> : vector<8x64xf32>
    %96 = tpu.matmul %93, %8, %cst_34 {dimension_numbers = #tpu.dot_dimension_numbers<[1], [0], [0], [1], [0, 0, 1, 1], [], []>} : vector<8x16xf32>, vector<16x64xf32>, vector<8x64xf32> -> vector<8x64xf32>
    %97 = arith.addf %95, %96 : vector<8x64xf32>
    %98 = arith.mulf %97, %19 : vector<8x64xf32>
    %99 = math.tanh %98 : vector<8x64xf32>
    %100 = arith.mulf %99, %19 : vector<8x64xf32>
    %101 = arith.addf %100, %24 : vector<8x64xf32>
    %102 = vector.extract_strided_slice %101 {offsets = [0, 0], sizes = [8, 16], strides = [1, 1]} : vector<8x64xf32> to vector<8x16xf32>
    %103 = vector.extract_strided_slice %101 {offsets = [0, 16], sizes = [8, 16], strides = [1, 1]} : vector<8x64xf32> to vector<8x16xf32>
    %104 = vector.extract_strided_slice %101 {offsets = [0, 32], sizes = [8, 16], strides = [1, 1]} : vector<8x64xf32> to vector<8x16xf32>
    %105 = vector.extract_strided_slice %101 {offsets = [0, 48], sizes = [8, 16], strides = [1, 1]} : vector<8x64xf32> to vector<8x16xf32>
    %106 = arith.mulf %103, %91 : vector<8x16xf32>
    %107 = arith.mulf %102, %104 : vector<8x16xf32>
    %108 = arith.addf %106, %107 : vector<8x16xf32>
    %109 = math.tanh %108 : vector<8x16xf32>
    %110 = arith.mulf %105, %109 : vector<8x16xf32>
    %c32_35 = arith.constant 32 : index
    %c0_36 = arith.constant 0 : index
    %111 = vector.load %arg9[%c32_35, %c0_36] : memref<64x16xf32, #tpu.memory_space<vmem>>, vector<8x16xf32>
    tpu.vector_store %arg9[%c32_35, %c0_36], %110 {strides = array<i32>} : memref<64x16xf32, #tpu.memory_space<vmem>>, vector<8x16xf32>,
    %c40 = arith.constant 40 : index
    %c0_37 = arith.constant 0 : index
    %112 = vector.load %arg8[%c40, %c0_37] : memref<64x64xf32, #tpu.memory_space<vmem>>, vector<8x64xf32>
    %cst_38 = arith.constant dense<0.000000e+00> : vector<8x64xf32>
    %113 = tpu.matmul %110, %8, %cst_38 {dimension_numbers = #tpu.dot_dimension_numbers<[1], [0], [0], [1], [0, 0, 1, 1], [], []>} : vector<8x16xf32>, vector<16x64xf32>, vector<8x64xf32> -> vector<8x64xf32>
    %114 = arith.addf %112, %113 : vector<8x64xf32>
    %115 = arith.mulf %114, %19 : vector<8x64xf32>
    %116 = math.tanh %115 : vector<8x64xf32>
    %117 = arith.mulf %116, %19 : vector<8x64xf32>
    %118 = arith.addf %117, %24 : vector<8x64xf32>
    %119 = vector.extract_strided_slice %118 {offsets = [0, 0], sizes = [8, 16], strides = [1, 1]} : vector<8x64xf32> to vector<8x16xf32>
    %120 = vector.extract_strided_slice %118 {offsets = [0, 16], sizes = [8, 16], strides = [1, 1]} : vector<8x64xf32> to vector<8x16xf32>
    %121 = vector.extract_strided_slice %118 {offsets = [0, 32], sizes = [8, 16], strides = [1, 1]} : vector<8x64xf32> to vector<8x16xf32>
    %122 = vector.extract_strided_slice %118 {offsets = [0, 48], sizes = [8, 16], strides = [1, 1]} : vector<8x64xf32> to vector<8x16xf32>
    %123 = arith.mulf %120, %108 : vector<8x16xf32>
    %124 = arith.mulf %119, %121 : vector<8x16xf32>
    %125 = arith.addf %123, %124 : vector<8x16xf32>
    %126 = math.tanh %125 : vector<8x16xf32>
    %127 = arith.mulf %122, %126 : vector<8x16xf32>
    %c40_39 = arith.constant 40 : index
    %c0_40 = arith.constant 0 : index
    %128 = vector.load %arg9[%c40_39, %c0_40] : memref<64x16xf32, #tpu.memory_space<vmem>>, vector<8x16xf32>
    tpu.vector_store %arg9[%c40_39, %c0_40], %127 {strides = array<i32>} : memref<64x16xf32, #tpu.memory_space<vmem>>, vector<8x16xf32>,
    %c48 = arith.constant 48 : index
    %c0_41 = arith.constant 0 : index
    %129 = vector.load %arg8[%c48, %c0_41] : memref<64x64xf32, #tpu.memory_space<vmem>>, vector<8x64xf32>
    %cst_42 = arith.constant dense<0.000000e+00> : vector<8x64xf32>
    %130 = tpu.matmul %127, %8, %cst_42 {dimension_numbers = #tpu.dot_dimension_numbers<[1], [0], [0], [1], [0, 0, 1, 1], [], []>} : vector<8x16xf32>, vector<16x64xf32>, vector<8x64xf32> -> vector<8x64xf32>
    %131 = arith.addf %129, %130 : vector<8x64xf32>
    %132 = arith.mulf %131, %19 : vector<8x64xf32>
    %133 = math.tanh %132 : vector<8x64xf32>
    %134 = arith.mulf %133, %19 : vector<8x64xf32>
    %135 = arith.addf %134, %24 : vector<8x64xf32>
    %136 = vector.extract_strided_slice %135 {offsets = [0, 0], sizes = [8, 16], strides = [1, 1]} : vector<8x64xf32> to vector<8x16xf32>
    %137 = vector.extract_strided_slice %135 {offsets = [0, 16], sizes = [8, 16], strides = [1, 1]} : vector<8x64xf32> to vector<8x16xf32>
    %138 = vector.extract_strided_slice %135 {offsets = [0, 32], sizes = [8, 16], strides = [1, 1]} : vector<8x64xf32> to vector<8x16xf32>
    %139 = vector.extract_strided_slice %135 {offsets = [0, 48], sizes = [8, 16], strides = [1, 1]} : vector<8x64xf32> to vector<8x16xf32>
    %140 = arith.mulf %137, %125 : vector<8x16xf32>
    %141 = arith.mulf %136, %138 : vector<8x16xf32>
    %142 = arith.addf %140, %141 : vector<8x16xf32>
    %143 = math.tanh %142 : vector<8x16xf32>
    %144 = arith.mulf %139, %143 : vector<8x16xf32>
    %c48_43 = arith.constant 48 : index
    %c0_44 = arith.constant 0 : index
    %145 = vector.load %arg9[%c48_43, %c0_44] : memref<64x16xf32, #tpu.memory_space<vmem>>, vector<8x16xf32>
    tpu.vector_store %arg9[%c48_43, %c0_44], %144 {strides = array<i32>} : memref<64x16xf32, #tpu.memory_space<vmem>>, vector<8x16xf32>,
    %c56 = arith.constant 56 : index
    %c0_45 = arith.constant 0 : index
    %146 = vector.load %arg8[%c56, %c0_45] : memref<64x64xf32, #tpu.memory_space<vmem>>, vector<8x64xf32>
    %cst_46 = arith.constant dense<0.000000e+00> : vector<8x64xf32>
    %147 = tpu.matmul %144, %8, %cst_46 {dimension_numbers = #tpu.dot_dimension_numbers<[1], [0], [0], [1], [0, 0, 1, 1], [], []>} : vector<8x16xf32>, vector<16x64xf32>, vector<8x64xf32> -> vector<8x64xf32>
    %148 = arith.addf %146, %147 : vector<8x64xf32>
    %149 = arith.mulf %148, %19 : vector<8x64xf32>
    %150 = math.tanh %149 : vector<8x64xf32>
    %151 = arith.mulf %150, %19 : vector<8x64xf32>
    %152 = arith.addf %151, %24 : vector<8x64xf32>
    %153 = vector.extract_strided_slice %152 {offsets = [0, 0], sizes = [8, 16], strides = [1, 1]} : vector<8x64xf32> to vector<8x16xf32>
    %154 = vector.extract_strided_slice %152 {offsets = [0, 16], sizes = [8, 16], strides = [1, 1]} : vector<8x64xf32> to vector<8x16xf32>
    %155 = vector.extract_strided_slice %152 {offsets = [0, 32], sizes = [8, 16], strides = [1, 1]} : vector<8x64xf32> to vector<8x16xf32>
    %156 = vector.extract_strided_slice %152 {offsets = [0, 48], sizes = [8, 16], strides = [1, 1]} : vector<8x64xf32> to vector<8x16xf32>
    %157 = arith.mulf %154, %142 : vector<8x16xf32>
    %158 = arith.mulf %153, %155 : vector<8x16xf32>
    %159 = arith.addf %157, %158 : vector<8x16xf32>
    %160 = math.tanh %159 : vector<8x16xf32>
    %161 = arith.mulf %156, %160 : vector<8x16xf32>
    %c56_47 = arith.constant 56 : index
    %c0_48 = arith.constant 0 : index
    %162 = vector.load %arg9[%c56_47, %c0_48] : memref<64x16xf32, #tpu.memory_space<vmem>>, vector<8x16xf32>
    tpu.vector_store %arg9[%c56_47, %c0_48], %161 {strides = array<i32>} : memref<64x16xf32, #tpu.memory_space<vmem>>, vector<8x16xf32>,
    %c0_49 = arith.constant 0 : index
    %c0_50 = arith.constant 0 : index
    %163 = tpu.strided_load %arg9[%c0_49, %c0_50] {strides = array<i32: 8, 1>} : memref<64x16xf32, #tpu.memory_space<vmem>>, vector<8x16xf32>
    %c1 = arith.constant 1 : index
    %c0_51 = arith.constant 0 : index
    %164 = tpu.strided_load %arg9[%c1, %c0_51] {strides = array<i32: 8, 1>} : memref<64x16xf32, #tpu.memory_space<vmem>>, vector<8x16xf32>
    %c2 = arith.constant 2 : index
    %c0_52 = arith.constant 0 : index
    %165 = tpu.strided_load %arg9[%c2, %c0_52] {strides = array<i32: 8, 1>} : memref<64x16xf32, #tpu.memory_space<vmem>>, vector<8x16xf32>
    %c3 = arith.constant 3 : index
    %c0_53 = arith.constant 0 : index
    %166 = tpu.strided_load %arg9[%c3, %c0_53] {strides = array<i32: 8, 1>} : memref<64x16xf32, #tpu.memory_space<vmem>>, vector<8x16xf32>
    %c4 = arith.constant 4 : index
    %c0_54 = arith.constant 0 : index
    %167 = tpu.strided_load %arg9[%c4, %c0_54] {strides = array<i32: 8, 1>} : memref<64x16xf32, #tpu.memory_space<vmem>>, vector<8x16xf32>
    %c5 = arith.constant 5 : index
    %c0_55 = arith.constant 0 : index
    %168 = tpu.strided_load %arg9[%c5, %c0_55] {strides = array<i32: 8, 1>} : memref<64x16xf32, #tpu.memory_space<vmem>>, vector<8x16xf32>
    %c6 = arith.constant 6 : index
    %c0_56 = arith.constant 0 : index
    %169 = tpu.strided_load %arg9[%c6, %c0_56] {strides = array<i32: 8, 1>} : memref<64x16xf32, #tpu.memory_space<vmem>>, vector<8x16xf32>
    %c7 = arith.constant 7 : index
    %c0_57 = arith.constant 0 : index
    %170 = tpu.strided_load %arg9[%c7, %c0_57] {strides = array<i32: 8, 1>} : memref<64x16xf32, #tpu.memory_space<vmem>>, vector<8x16xf32>
    %171 = tpu.concatenate %163, %164, %165, %166, %167, %168, %169, %170 in 0 : vector<8x16xf32>, vector<8x16xf32>, vector<8x16xf32>, vector<8x16xf32>, vector<8x16xf32>, vector<8x16xf32>, vector<8x16xf32>, vector<8x16xf32> -> vector<64x16xf32>
    %172 = arith.truncf %171 : vector<64x16xf32> to vector<64x16xbf16>
    %c0_58 = arith.constant 0 : index
    %c0_59 = arith.constant 0 : index
    %173 = vector.load %arg5[%c0_58, %c0_59] : memref<16x128xbf16, #tpu.memory_space<vmem>>, vector<16x128xbf16>
    %cst_60 = arith.constant dense<0.000000e+00> : vector<64x128xf32>
    %174 = tpu.matmul %172, %173, %cst_60 {dimension_numbers = #tpu.dot_dimension_numbers<[1], [0], [0], [1], [0, 0, 1, 1], [], []>} : vector<64x16xbf16>, vector<16x128xbf16>, vector<64x128xf32> -> vector<64x128xf32>
    %c0_61 = arith.constant 0 : index
    %c0_62 = arith.constant 0 : index
    %175 = vector.load %arg6[%c0_61, %c0_62] : memref<1x128xf32, #tpu.memory_space<vmem>>, vector<1x128xf32>
    %176 = vector.broadcast %175 : vector<1x128xf32> to vector<64x128xf32>
    %177 = arith.addf %174, %176 : vector<64x128xf32>
    %c0_63 = arith.constant 0 : index
    %c0_64 = arith.constant 0 : index
    %c0_65 = arith.constant 0 : index
    %178 = vector.load %arg7[%c0_63, %c0_64, %c0_65] : memref<1x64x128xf32, #tpu.memory_space<vmem>>, vector<1x64x128xf32>
    %179 = vector.shape_cast %178 : vector<1x64x128xf32> to vector<64x128xf32>
    %180 = vector.shape_cast %177 : vector<64x128xf32> to vector<1x64x128xf32>
    tpu.vector_store %arg7[%c0_63, %c0_64, %c0_65], %180 {strides = array<i32>} : memref<1x64x128xf32, #tpu.memory_space<vmem>>, vector<1x64x128xf32>,
    return
  }
  func.func @transform_0(%arg0: i32) -> (i32, i32, i32) {
    %c0_i32 = arith.constant 0 : i32
    %c0_i32_0 = arith.constant 0 : i32
    %c0_i32_1 = arith.constant 0 : i32
    return %arg0, %c0_i32, %c0_i32_0 : i32, i32, i32
  }
  func.func @transform_1(%arg0: i32) -> (i32, i32) {
    %c0_i32 = arith.constant 0 : i32
    %c0_i32_0 = arith.constant 0 : i32
    %c0_i32_1 = arith.constant 0 : i32
    return %c0_i32, %c0_i32_0 : i32, i32
  }
  func.func @transform_2(%arg0: i32) -> (i32, i32) {
    %c0_i32 = arith.constant 0 : i32
    %c0_i32_0 = arith.constant 0 : i32
    %c0_i32_1 = arith.constant 0 : i32
    return %c0_i32, %c0_i32_0 : i32, i32
  }
  func.func @transform_3(%arg0: i32) -> (i32, i32) {
    %c0_i32 = arith.constant 0 : i32
    %c0_i32_0 = arith.constant 0 : i32
    %c0_i32_1 = arith.constant 0 : i32
    return %c0_i32, %c0_i32_0 : i32, i32
  }
  func.func @transform_4(%arg0: i32) -> (i32, i32) {
    %c0_i32 = arith.constant 0 : i32
    %c0_i32_0 = arith.constant 0 : i32
    %c0_i32_1 = arith.constant 0 : i32
    return %c0_i32, %c0_i32_0 : i32, i32
  }
  func.func @transform_5(%arg0: i32) -> (i32, i32) {
    %c0_i32 = arith.constant 0 : i32
    %c0_i32_0 = arith.constant 0 : i32
    %c0_i32_1 = arith.constant 0 : i32
    return %c0_i32, %c0_i32_0 : i32, i32
  }
  func.func @transform_6(%arg0: i32) -> (i32, i32, i32) {
    %c0_i32 = arith.constant 0 : i32
    %c0_i32_0 = arith.constant 0 : i32
    %c0_i32_1 = arith.constant 0 : i32
    return %arg0, %c0_i32, %c0_i32_0 : i32, i32, i32
  }
}

</mosaic_0001>

<bundles_post_ra>
// kernel: autoregressive_lstm_forward.1
= control target key start
LH: loop header
LB: loop body
LE: loop exit
PB: predicated region body
PF: predicated region fallthrough
CT: control target
= control target key end

     0   :  { %v1295_v1 = vmov 0.0   ;;  %vm1296_vm0 = vmmov 0   ;;  %vm75_vm1 = vcmask 261120   ;;  %vm153_vm2 = vcmask 523264   ;;  %s1299_s12 = smov 16   ;;  %s1300_s13 = smov 32   ;;  %s1538_s1 = inlined_call_operand.vmem [shape: bf16[32,64], index: 1, kind: input, shape index: {}]   ;;  %s1539_s0 = inlined_call_operand.vmem [shape: bf16[1,64,32], index: 0, kind: input, shape index: {}]   ;;  %s1540_s2 = inlined_call_operand.vmem [shape: f32[16,64], index: 2, kind: input, shape index: {}]   ;;  %s1541_s3 = inlined_call_operand.vmem [shape: f32[1,64], index: 3, kind: input, shape index: {}]   ;;  %s1542_s4 = inlined_call_operand.vmem [shape: bf16[16,128], index: 4, kind: input, shape index: {}]   ;;  %s1543_s5 = inlined_call_operand.vmem [shape: f32[1,128], index: 5, kind: input, shape index: {}]   ;;  %s1544_s6 = inlined_call_operand.vmem [shape: f32[1,64,128], index: 6, kind: output, shape index: {}]  }
   0x1   :  { %v1256_v0 = vld [vmem:[%s1538_s1 + $0x8] sm:$0xff]   ;;  %1190 = vmatprep.subr.mxu1 %v1295_v1  ;;  %1194 = vmatprep.mubr.msk.f32.mxu1 %vm1296_vm0, %v1295_v1  ;;  %v1257_v2 = vld [vmem:[%s1538_s1] sm:$0xff]   ;;  %v1260_v7 = vld [vmem:[%s1539_s0 + $0x10] sm:$0xff]   ;;  %v164_v13 = vlaneseq  ;;  %v1297_v28 = vmov 0.5   ;;  %s1301_s14 = smov 80   ;;  %vm172_vm6 = vcmask 130048  }
   0x2   :  { %1171 = vmatprep.subr.bf16.mxu0 %v1256_v0  ;;  %v1258_v3 = vld [vmem:[%s1539_s0] sm:$0xff]   ;;  %v1353_v4 = vld [vmem:[%s1540_s2 + $0x8] sm:$0xff]  ;;  %v1261_v8 = vld [vmem:[%s1539_s0 + $0x18] sm:$0xff]  }
   0x3   :  { %1172 = vmatpush3.bf16.msra.mxu0 %v1256_v0  ;;  %1175 = vmatprep.mubr.msk.bf16.mxu0 %vm75_vm1, %v1258_v3  ;;  %v1259_v5 = vld [vmem:[%s1539_s0 + $0x8] sm:$0xff]   ;;  %v1362_v6 = vld [vmem:[%s1540_s2] sm:$0xff]  ;;  %v165_v18 = vand.u32 127, %v164_v13 }
   0x4   :  { %1173 = vmatprep.subr.bf16.mxu0 %v1257_v2  ;;  %1191 = vmatpush3.msra.mxu1 %v1353_v4  ;;  %v1112_v9 = vld [vmem:[%s1541_s3] ss:$0 sm:$0xff]  ;;  %s1298_s3 = smov 96  }
   0x5   :  { %1192 = vmatprep.subr.mxu1 %v1295_v1  ;;  %vm166_vm3 = vcmp.ge.s32.totalorder %v165_v18, 32  ;;  %vm167_vm4 = vcmp.lt.s32.totalorder %v165_v18, 48 }
   0x6   :  { %1193 = vmatpush3.msra.mxu1 %v1362_v6  ;;  %vm168_vm5 = vmand %vm166_vm3, %vm167_vm4 }
   0x7   :  { %1174 = vmatpush3.bf16.msra.mxu0 %v1257_v2  ;;  %1197 = vmatprep.subr.mxu1 %v1295_v1  ;;  %v1400_v29 = vsel %vm168_vm5, 1.0, %v1297_v28  ;;  %v1404_v36 = vsel %vm168_vm5, 0.0, %v1297_v28 }
   0x8   :  { %1183 = vmatprep.subr.mxu0 %v1295_v1 }
   0xa   :  { %1176 = vmatmul.mubr.msk.bf16.vlgmr.msra.gmra.mxu0 %vm75_vm1, %v1259_v5 }
   0xb   :  { %1184 = vmatpush3.msra.mxu0 %v1353_v4  ;;  %1179 = vmatprep.mubr.msk.bf16.mxu0 %vm75_vm1, %v1260_v7 }
   0xc   :  { %1185 = vmatprep.subr.mxu0 %v1295_v1 }
   0xd   :  { %1186 = vmatpush3.msra.mxu0 %v1362_v6 }
   0xe   :  { %1218 = vmatprep.subr.mxu0 %v1295_v1 }
  0x12   :  { %1180 = vmatmul.mubr.msk.bf16.gmra.mxu0 %vm75_vm1, %v1261_v8 }
  0x13   :  { %1187 = vmatprep.mubr.msk.f32.mxu0 %vm1296_vm0, %v1295_v1 }
  0x1a   :  { %1188 = vmatmul.mubr.f32.vlgmr.msra.gmra.mxu0 %v1295_v1 }
  0x1b   :  { %1219 = vmatpush3.msra.mxu0 %v1353_v4  ;;  %1222 = vmatprep.mubr.msk.f32.mxu0 %vm1296_vm0, %v1295_v1 }
  0x1c   :  { %1220 = vmatprep.subr.mxu0 %v1295_v1 }
  0x1d   :  { %1221 = vmatpush3.msra.mxu0 %v1362_v6 }
  0x1e   :  { %1232 = vmatprep.subr.mxu0 %v1295_v1 }
  0xca   :  { %v1177_v10 = vpop.f32.mrf.mxu0 }
  0xcb   :  { %v131_v11 = vadd.f32 %v1177_v10, %v1112_v9 }
  0xcc   :  { %v122_v12 = vpop.f32.mrf.mxu0 }
  0xcd   :  { %156 = vst.msk [vmem:[#allocation2 + $0x10] sm:$0xff] %vm153_vm2, %v131_v11  ;;  %v123_v14 = vadd.f32 %v1112_v9, %v122_v12 }
  0xce   :  { %v1178_v15 = vpop.f32.mrf.mxu0 }
  0xcf   :  { %154 = vst.msk [vmem:[#allocation2] sm:$0xff] %vm153_vm2, %v123_v14  ;;  %v134_v16 = vadd.f32 %v1178_v15, %v1112_v9 }
  0xd0   :  { %v125_v17 = vpop.f32.mrf.mxu0 }
  0xd1   :  { %157 = vst.msk [vmem:[#allocation2 + $0x18] sm:$0xff] %vm153_vm2, %v134_v16  ;;  %v126_v19 = vadd.f32 %v1112_v9, %v125_v17 }
  0xd2   :  { %v1181_v20 = vpop.f32.mrf.mxu0 }
  0xd3   :  { %155 = vst.msk [vmem:[#allocation2 + $0x8] sm:$0xff] %vm153_vm2, %v126_v19  ;;  %v147_v21 = vadd.f32 %v1181_v20, %v1112_v9 }
  0xd4   :  { %v138_v22 = vpop.f32.mrf.mxu0  ;;  %v373_v2 = vld [vmem:[#allocation2 + $0x10] sm:$0xff] }
  0xd5   :  { %160 = vst.msk [vmem:[#allocation2 + $0x30] sm:$0xff] %vm153_vm2, %v147_v21  ;;  %v139_v23 = vadd.f32 %v1112_v9, %v138_v22 }
  0xd6   :  { %v1182_v24 = vpop.f32.mrf.mxu0  ;;  %v171_v30 = vld [vmem:[#allocation2] sm:$0xff] }
  0xd7   :  { %158 = vst.msk [vmem:[#allocation2 + $0x20] sm:$0xff] %vm153_vm2, %v139_v23  ;;  %v150_v25 = vadd.f32 %v1182_v24, %v1112_v9 }
  0xd8   :  { %v141_v26 = vpop.f32.mrf.mxu0  ;;  %v473_v21 = vld [vmem:[#allocation2 + $0x18] sm:$0xff] }
  0xd9   :  { %161 = vst.msk [vmem:[#allocation2 + $0x38] sm:$0xff] %vm153_vm2, %v150_v25  ;;  %v142_v27 = vadd.f32 %v1112_v9, %v141_v26 }
  0xda   :  { %v242_v31 = vpop.f32.mrf.mxu0  ;;  %v273_v48 = vld [vmem:[#allocation2 + $0x8] sm:$0xff] }
  0xdb   :  { %159 = vst.msk [vmem:[#allocation2 + $0x28] sm:$0xff] %vm153_vm2, %v142_v27  ;;  %v246_v32 = vadd.f32 %v242_v31, %v171_v30 }
  0xdc   :  { %v1189_v33 = vpop.f32.mrf.mxu0 }
  0xdd   :  { %v247_v34 = vmul.f32 %v246_v32, %v1400_v29 }
  0xdf   :  { %1263 = vtanh.f32 %v247_v34 }
  0xec   :  { %v1264_v35 = vpop.eup %1263 }
  0xed   :  { %v249_v37 = vmul.f32 %v1264_v35, %v1400_v29 }
  0xef   :  { %v250_v38 = vadd.f32 %v249_v37, %v1404_v36 }
  0xf1   :  { %253 = vrot.lane.b32.xlu0 %v250_v38, %s1298_s3  ;;  %v251_v41 = vmul.f32 0.0, %v250_v38 }
 0x163   :  { %v254_v39 = vpop.permute.xlu0 %253 }
 0x164   :  { %v256_v40 = vmul.f32 %v254_v39, %v250_v38 }
 0x166   :  { %258 = vrot.lane.b32.xlu0 %v256_v40, %s1299_s12  ;;  %v573_v40 = vld [vmem:[#allocation2 + $0x20] sm:$0xff] }
 0x1d8   :  { %v259_v42 = vpop.permute.xlu0 %258 }
 0x1d9   :  { %v261_v43 = vadd.f32 %v259_v42, %v251_v41 }
 0x1db   :  { %1265 = vtanh.f32 %v261_v43 }
 0x1e8   :  { %v1266_v44 = vpop.eup %1265 }
 0x1e9   :  { %264 = vrot.lane.b32.xlu1 %v1266_v44, %s1300_s13 }
 0x25b   :  { %v265_v45 = vpop.permute.xlu1 %264 }
 0x25c   :  { %v267_v46 = vmul.f32 %v265_v45, %v250_v38 }
 0x25e   :  { %269 = vrot.lane.b32.xlu1 %v267_v46, %s1301_s14 }
 0x2d0   :  { %v270_v47 = vpop.permute.xlu1 %269 }
 0x2d1   :  { %272 = vst.msk [vmem:[#allocation3] sm:$0xff] %vm172_vm6, %v270_v47  ;;  %1195 = vmatmul.mubr.msk.f32.vlgmr.msra.gmra.mxu1 %vm172_vm6, %v270_v47 }
 0x2d2   :  { %1198 = vmatpush3.msra.mxu1 %v1353_v4  ;;  %1201 = vmatprep.mubr.msk.f32.mxu1 %vm1296_vm0, %v1295_v1 }
 0x2d3   :  { %1199 = vmatprep.subr.mxu1 %v1295_v1 }
 0x2d4   :  { %1200 = vmatpush3.msra.mxu1 %v1362_v6 }
 0x2d5   :  { %1204 = vmatprep.subr.mxu1 %v1295_v1 }
 0x391   :  { %v342_v49 = vpop.f32.mrf.mxu1 }
 0x392   :  { %v346_v50 = vadd.f32 %v342_v49, %v273_v48 }
 0x393   :  { %v1196_v51 = vpop.f32.mrf.mxu1 }
 0x394   :  { %v347_v52 = vmul.f32 %v346_v50, %v1400_v29 }
 0x396   :  { %1267 = vtanh.f32 %v347_v52 }
 0x3a3   :  { %v1268_v53 = vpop.eup %1267 }
 0x3a4   :  { %v349_v54 = vmul.f32 %v1268_v53, %v1400_v29 }
 0x3a6   :  { %v350_v55 = vadd.f32 %v349_v54, %v1404_v36 }
 0x3a8   :  { %353 = vrot.lane.b32.xlu0 %v350_v55, %s1298_s3  ;;  %v351_v58 = vmul.f32 %v350_v55, %v261_v43 }
 0x41a   :  { %v354_v56 = vpop.permute.xlu0 %353 }
 0x41b   :  { %v356_v57 = vmul.f32 %v354_v56, %v350_v55 }
 0x41d   :  { %358 = vrot.lane.b32.xlu1 %v356_v57, %s1299_s12  ;;  %v673_v57 = vld [vmem:[#allocation2 + $0x28] sm:$0xff] }
 0x48f   :  { %v359_v59 = vpop.permute.xlu1 %358 }
 0x490   :  { %v361_v60 = vadd.f32 %v359_v59, %v351_v58 }
 0x492   :  { %1269 = vtanh.f32 %v361_v60 }
 0x49f   :  { %v1270_v61 = vpop.eup %1269 }
 0x4a0   :  { %364 = vrot.lane.b32.xlu0 %v1270_v61, %s1300_s13 }
 0x512   :  { %v365_v62 = vpop.permute.xlu0 %364 }
 0x513   :  { %v367_v63 = vmul.f32 %v365_v62, %v350_v55 }
 0x515   :  { %369 = vrot.lane.b32.xlu1 %v367_v63, %s1301_s14 }
 0x587   :  { %v370_v0 = vpop.permute.xlu1 %369 }
 0x588   :  { %372 = vst.msk [vmem:[#allocation3 + $0x8] sm:$0xff] %vm172_vm6, %v370_v0  ;;  %1202 = vmatmul.mubr.msk.f32.vlgmr.msra.gmra.mxu1 %vm172_vm6, %v370_v0 }
 0x589   :  { %1205 = vmatpush3.msra.mxu1 %v1353_v4  ;;  %1208 = vmatprep.mubr.msk.f32.mxu1 %vm1296_vm0, %v1295_v1 }
 0x58a   :  { %1206 = vmatprep.subr.mxu1 %v1295_v1 }
 0x58b   :  { %1207 = vmatpush3.msra.mxu1 %v1362_v6 }
 0x58c   :  { %1211 = vmatprep.subr.mxu1 %v1295_v1 }
 0x648   :  { %v442_v3 = vpop.f32.mrf.mxu1 }
 0x649   :  { %v446_v5 = vadd.f32 %v442_v3, %v373_v2 }
 0x64a   :  { %v1203_v7 = vpop.f32.mrf.mxu1 }
 0x64b   :  { %v447_v8 = vmul.f32 %v446_v5, %v1400_v29 }
 0x64d   :  { %1271 = vtanh.f32 %v447_v8 }
 0x65a   :  { %v1272_v9 = vpop.eup %1271 }
 0x65b   :  { %v449_v10 = vmul.f32 %v1272_v9, %v1400_v29 }
 0x65d   :  { %v450_v11 = vadd.f32 %v449_v10, %v1404_v36  ;;  %v773_v10 = vld [vmem:[#allocation2 + $0x30] sm:$0xff] }
 0x65f   :  { %453 = vrot.lane.b32.xlu0 %v450_v11, %s1298_s3  ;;  %v451_v14 = vmul.f32 %v450_v11, %v361_v60 }
 0x6d1   :  { %v454_v12 = vpop.permute.xlu0 %453 }
 0x6d2   :  { %v456_v13 = vmul.f32 %v454_v12, %v450_v11 }
 0x6d4   :  { %458 = vrot.lane.b32.xlu1 %v456_v13, %s1299_s12 }
 0x746   :  { %v459_v15 = vpop.permute.xlu1 %458 }
 0x747   :  { %v461_v16 = vadd.f32 %v459_v15, %v451_v14 }
 0x749   :  { %1273 = vtanh.f32 %v461_v16 }
 0x756   :  { %v1274_v17 = vpop.eup %1273 }
 0x757   :  { %464 = vrot.lane.b32.xlu0 %v1274_v17, %s1300_s13 }
 0x7c9   :  { %v465_v18 = vpop.permute.xlu0 %464 }
 0x7ca   :  { %v467_v19 = vmul.f32 %v465_v18, %v450_v11 }
 0x7cc   :  { %469 = vrot.lane.b32.xlu1 %v467_v19, %s1301_s14 }
 0x83e   :  { %v470_v20 = vpop.permute.xlu1 %469 }
 0x83f   :  { %472 = vst.msk [vmem:[#allocation3 + $0x10] sm:$0xff] %vm172_vm6, %v470_v20  ;;  %1209 = vmatmul.mubr.msk.f32.vlgmr.msra.gmra.mxu1 %vm172_vm6, %v470_v20 }
 0x840   :  { %1212 = vmatpush3.msra.mxu1 %v1353_v4  ;;  %1215 = vmatprep.mubr.msk.f32.mxu1 %vm1296_vm0, %v1295_v1 }
 0x841   :  { %1213 = vmatprep.subr.mxu1 %v1295_v1 }
 0x842   :  { %1214 = vmatpush3.msra.mxu1 %v1362_v6 }
 0x843   :  { %1225 = vmatprep.subr.mxu1 %v1295_v1 }
 0x8ff   :  { %v542_v22 = vpop.f32.mrf.mxu1 }
 0x900   :  { %v546_v23 = vadd.f32 %v542_v22, %v473_v21 }
 0x901   :  { %v1210_v24 = vpop.f32.mrf.mxu1 }
 0x902   :  { %v547_v25 = vmul.f32 %v546_v23, %v1400_v29 }
 0x904   :  { %1275 = vtanh.f32 %v547_v25 }
 0x911   :  { %v1276_v26 = vpop.eup %1275 }
 0x912   :  { %v549_v27 = vmul.f32 %v1276_v26, %v1400_v29 }
 0x914   :  { %v550_v28 = vadd.f32 %v549_v27, %v1404_v36  ;;  %v873_v27 = vld [vmem:[#allocation2 + $0x38] sm:$0xff] }
 0x916   :  { %553 = vrot.lane.b32.xlu0 %v550_v28, %s1298_s3  ;;  %v551_v32 = vmul.f32 %v550_v28, %v461_v16 }
 0x988   :  { %v554_v30 = vpop.permute.xlu0 %553 }
 0x989   :  { %v556_v31 = vmul.f32 %v554_v30, %v550_v28 }
 0x98b   :  { %558 = vrot.lane.b32.xlu1 %v556_v31, %s1299_s12 }
 0x9fd   :  { %v559_v33 = vpop.permute.xlu1 %558 }
 0x9fe   :  { %v561_v34 = vadd.f32 %v559_v33, %v551_v32 }
 0xa00   :  { %1277 = vtanh.f32 %v561_v34 }
 0xa0d   :  { %v1278_v35 = vpop.eup %1277 }
 0xa0e   :  { %564 = vrot.lane.b32.xlu0 %v1278_v35, %s1300_s13 }
 0xa80   :  { %v565_v37 = vpop.permute.xlu0 %564 }
 0xa81   :  { %v567_v38 = vmul.f32 %v565_v37, %v550_v28 }
 0xa83   :  { %569 = vrot.lane.b32.xlu1 %v567_v38, %s1301_s14 }
 0xaf5   :  { %v570_v39 = vpop.permute.xlu1 %569 }
 0xaf6   :  { %572 = vst.msk [vmem:[#allocation3 + $0x18] sm:$0xff] %vm172_vm6, %v570_v39  ;;  %1216 = vmatmul.mubr.msk.f32.vlgmr.msra.gmra.mxu1 %vm172_vm6, %v570_v39 }
 0xaf7   :  { %1226 = vmatpush3.msra.mxu1 %v1353_v4  ;;  %1229 = vmatprep.mubr.msk.f32.mxu1 %vm1296_vm0, %v1295_v1 }
 0xaf8   :  { %1227 = vmatprep.subr.mxu1 %v1295_v1 }
 0xaf9   :  { %1228 = vmatpush3.msra.mxu1 %v1362_v6 }
 0xbb6   :  { %v642_v41 = vpop.f32.mrf.mxu1 }
 0xbb7   :  { %v646_v42 = vadd.f32 %v642_v41, %v573_v40 }
 0xbb8   :  { %v1217_v43 = vpop.f32.mrf.mxu1 }
 0xbb9   :  { %v647_v44 = vmul.f32 %v646_v42, %v1400_v29  ;;  %v1262_v43 = vld [vmem:[%s1542_s4] sm:$0xff]  }
 0xbba   :  { %1239 = vmatprep.subr.bf16.mxu1 %v1262_v43 }
 0xbbb   :  { %1279 = vtanh.f32 %v647_v44 }
 0xbc8   :  { %v1280_v45 = vpop.eup %1279 }
 0xbc9   :  { %v649_v46 = vmul.f32 %v1280_v45, %v1400_v29  ;;  %v973_v45 = vld [vmem:[#allocation3] ss:$8 sm:$0xf] }
 0xbcb   :  { %v650_v47 = vadd.f32 %v649_v46, %v1404_v36  ;;  %v977_v46 = vld [vmem:[#allocation3 + $0x1] ss:$8 sm:$0xf] }
 0xbcd   :  { %653 = vrot.lane.b32.xlu0 %v650_v47, %s1298_s3  ;;  %v651_v50 = vmul.f32 %v650_v47, %v561_v34 }
 0xc3f   :  { %v654_v48 = vpop.permute.xlu0 %653 }
 0xc40   :  { %v656_v49 = vmul.f32 %v654_v48, %v650_v47  ;;  %v985_v48 = vld [vmem:[#allocation3 + $0x3] ss:$8 sm:$0xf] }
 0xc42   :  { %658 = vrot.lane.b32.xlu1 %v656_v49, %s1299_s12 }
 0xcb4   :  { %v659_v51 = vpop.permute.xlu1 %658 }
 0xcb5   :  { %v661_v52 = vadd.f32 %v659_v51, %v651_v50  ;;  %v989_v51 = vld [vmem:[#allocation3 + $0x4] ss:$8 sm:$0xf] }
 0xcb7   :  { %1281 = vtanh.f32 %v661_v52 }
 0xcc4   :  { %v1282_v53 = vpop.eup %1281 }
 0xcc5   :  { %664 = vrot.lane.b32.xlu0 %v1282_v53, %s1300_s13 }
 0xd37   :  { %v665_v54 = vpop.permute.xlu0 %664 }
 0xd38   :  { %v667_v55 = vmul.f32 %v665_v54, %v650_v47  ;;  %v981_v47 = vld [vmem:[#allocation3 + $0x2] ss:$8 sm:$0xf] }
 0xd3a   :  { %669 = vrot.lane.b32.xlu1 %v667_v55, %s1301_s14 }
 0xdac   :  { %v670_v56 = vpop.permute.xlu1 %669 }
 0xdad   :  { %672 = vst.msk [vmem:[#allocation3 + $0x20] sm:$0xff] %vm172_vm6, %v670_v56  ;;  %1223 = vmatmul.mubr.msk.f32.vlgmr.msra.gmra.mxu0 %vm172_vm6, %v670_v56 }
 0xdae   :  { %1233 = vmatpush3.msra.mxu0 %v1353_v4  ;;  %1236 = vmatprep.mubr.msk.f32.mxu0 %vm1296_vm0, %v1295_v1 }
 0xdaf   :  { %1234 = vmatprep.subr.mxu0 %v1295_v1 }
 0xdb0   :  { %1235 = vmatpush3.msra.mxu0 %v1362_v6 }
 0xe6d   :  { %v742_v58 = vpop.f32.mrf.mxu0 }
 0xe6e   :  { %v746_v59 = vadd.f32 %v742_v58, %v673_v57 }
 0xe6f   :  { %v1224_v60 = vpop.f32.mrf.mxu0 }
 0xe70   :  { %v747_v61 = vmul.f32 %v746_v59, %v1400_v29 }
 0xe72   :  { %1283 = vtanh.f32 %v747_v61 }
 0xe7f   :  { %v1284_v62 = vpop.eup %1283 }
 0xe80   :  { %v749_v63 = vmul.f32 %v1284_v62, %v1400_v29 }
 0xe82   :  { %v750_v0 = vadd.f32 %v749_v63, %v1404_v36 }
 0xe84   :  { %753 = vrot.lane.b32.xlu0 %v750_v0, %s1298_s3  ;;  %v751_v1 = vmul.f32 %v750_v0, %v661_v52  ;;  %v993_v52 = vld [vmem:[#allocation3 + $0x5] ss:$8 sm:$0xf] }
 0xef6   :  { %v754_v4 = vpop.permute.xlu0 %753 }
 0xef7   :  { %v756_v2 = vmul.f32 %v754_v4, %v750_v0 }
 0xef9   :  { %758 = vrot.lane.b32.xlu1 %v756_v2, %s1299_s12 }
 0xf6b   :  { %v759_v6 = vpop.permute.xlu1 %758 }
 0xf6c   :  { %v761_v3 = vadd.f32 %v759_v6, %v751_v1  ;;  %v997_v6 = vld [vmem:[#allocation3 + $0x6] ss:$8 sm:$0xf] }
 0xf6e   :  { %1285 = vtanh.f32 %v761_v3 }
 0xf7b   :  { %v1286_v5 = vpop.eup %1285 }
 0xf7c   :  { %764 = vrot.lane.b32.xlu0 %v1286_v5, %s1300_s13 }
 0xfee   :  { %v765_v7 = vpop.permute.xlu0 %764 }
 0xfef   :  { %v767_v8 = vmul.f32 %v765_v7, %v750_v0 }
 0xff1   :  { %769 = vrot.lane.b32.xlu1 %v767_v8, %s1301_s14 }
0x1063   :  { %v770_v9 = vpop.permute.xlu1 %769 }
0x1064   :  { %772 = vst.msk [vmem:[#allocation3 + $0x28] sm:$0xff] %vm172_vm6, %v770_v9  ;;  %1230 = vmatmul.mubr.msk.f32.vlgmr.msra.gmra.mxu1 %vm172_vm6, %v770_v9  ;;  %v1130_v9 = vld [vmem:[%s1543_s5] ss:$0 sm:$0xff] }
0x1065   :  { %1240 = vmatpush3.bf16.msra.mxu1 %v1262_v43 }
0x1124   :  { %v842_v11 = vpop.f32.mrf.mxu1 }
0x1125   :  { %v846_v12 = vadd.f32 %v842_v11, %v773_v10 }
0x1126   :  { %v1231_v13 = vpop.f32.mrf.mxu1 }
0x1127   :  { %v847_v14 = vmul.f32 %v846_v12, %v1400_v29 }
0x1129   :  { %1287 = vtanh.f32 %v847_v14 }
0x1136   :  { %v1288_v15 = vpop.eup %1287 }
0x1137   :  { %v849_v16 = vmul.f32 %v1288_v15, %v1400_v29 }
0x1139   :  { %v850_v17 = vadd.f32 %v849_v16, %v1404_v36 }
0x113b   :  { %853 = vrot.lane.b32.xlu0 %v850_v17, %s1298_s3  ;;  %v851_v20 = vmul.f32 %v850_v17, %v761_v3  ;;  %v1001_v3 = vld [vmem:[#allocation3 + $0x7] ss:$8 sm:$0xf] }
0x11ad   :  { %v854_v18 = vpop.permute.xlu0 %853 }
0x11ae   :  { %v856_v19 = vmul.f32 %v854_v18, %v850_v17 }
0x11b0   :  { %858 = vrot.lane.b32.xlu1 %v856_v19, %s1299_s12 }
0x1222   :  { %v859_v21 = vpop.permute.xlu1 %858 }
0x1223   :  { %v861_v22 = vadd.f32 %v859_v21, %v851_v20 }
0x1225   :  { %1289 = vtanh.f32 %v861_v22 }
0x1232   :  { %v1290_v23 = vpop.eup %1289 }
0x1233   :  { %864 = vrot.lane.b32.xlu0 %v1290_v23, %s1300_s13 }
0x12a5   :  { %v865_v24 = vpop.permute.xlu0 %864 }
0x12a6   :  { %v867_v25 = vmul.f32 %v865_v24, %v850_v17 }
0x12a8   :  { %869 = vrot.lane.b32.xlu1 %v867_v25, %s1301_s14 }
0x131a   :  { %v870_v26 = vpop.permute.xlu1 %869 }
0x131b   :  { %872 = vst.msk [vmem:[#allocation3 + $0x30] sm:$0xff] %vm172_vm6, %v870_v26  ;;  %1237 = vmatmul.mubr.msk.f32.vlgmr.msra.gmra.mxu0 %vm172_vm6, %v870_v26 }
0x13db   :  { %v942_v28 = vpop.f32.mrf.mxu0 }
0x13dc   :  { %v946_v30 = vadd.f32 %v942_v28, %v873_v27 }
0x13dd   :  { %v1238_v31 = vpop.f32.mrf.mxu0 }
0x13de   :  { %v947_v32 = vmul.f32 %v946_v30, %v1400_v29 }
0x13e0   :  { %1291 = vtanh.f32 %v947_v32 }
0x13ed   :  { %v1292_v33 = vpop.eup %1291 }
0x13ee   :  { %v949_v34 = vmul.f32 %v1292_v33, %v1400_v29 }
0x13f0   :  { %v950_v35 = vadd.f32 %v949_v34, %v1404_v36 }
0x13f2   :  { %953 = vrot.lane.b32.xlu0 %v950_v35, %s1298_s3  ;;  %v951_v39 = vmul.f32 %v950_v35, %v861_v22 }
0x1464   :  { %v954_v37 = vpop.permute.xlu0 %953 }
0x1465   :  { %v956_v38 = vmul.f32 %v954_v37, %v950_v35 }
0x1467   :  { %958 = vrot.lane.b32.xlu1 %v956_v38, %s1299_s12 }
0x14d9   :  { %v959_v40 = vpop.permute.xlu1 %958 }
0x14da   :  { %v961_v41 = vadd.f32 %v959_v40, %v951_v39 }
0x14dc   :  { %1293 = vtanh.f32 %v961_v41 }
0x14e9   :  { %v1294_v42 = vpop.eup %1293 }
0x14ea   :  { %964 = vrot.lane.b32.xlu0 %v1294_v42, %s1300_s13 }
0x155c   :  { %v965_v29 = vpop.permute.xlu0 %964 }
0x155d   :  { %v967_v36 = vmul.f32 %v965_v29, %v950_v35 }
0x155f   :  { %969 = vrot.lane.b32.xlu1 %v967_v36, %s1301_s14 }
0x15d1   :  { %v970_v44 = vpop.permute.xlu1 %969 }
0x15d2   :  { %972 = vst.msk [vmem:[#allocation3 + $0x38] sm:$0xff] %vm172_vm6, %v970_v44 }
0x15d9   :  { %v974_v49 = vld [vmem:[#allocation3] ss:$8 sm:$0xf0]  ;;  %v978_v50 = vld [vmem:[#allocation3 + $0x1] ss:$8 sm:$0xf0] }
0x15da   :  { %v975_v53 = vor.u32 %v974_v49, %v973_v45  ;;  %v979_v54 = vor.u32 %v978_v50, %v977_v46  ;;  %v982_v55 = vld [vmem:[#allocation3 + $0x2] ss:$8 sm:$0xf0]  ;;  %v986_v56 = vld [vmem:[#allocation3 + $0x3] ss:$8 sm:$0xf0] }
0x15db   :  { %v983_v57 = vor.u32 %v982_v55, %v981_v47  ;;  %v987_v58 = vor.u32 %v986_v56, %v985_v48  ;;  %v990_v59 = vld [vmem:[#allocation3 + $0x4] ss:$8 sm:$0xf0]  ;;  %v994_v60 = vld [vmem:[#allocation3 + $0x5] ss:$8 sm:$0xf0] }
0x15dc   :  { %v1004_v61 = vpack.c.bf16 %v979_v54, %v975_v53  ;;  %v991_v62 = vor.u32 %v990_v59, %v989_v51  ;;  %v995_v63 = vor.u32 %v994_v60, %v993_v52  ;;  %v998_v2 = vld [vmem:[#allocation3 + $0x6] ss:$8 sm:$0xf0]  ;;  %v1002_v1 = vld [vmem:[#allocation3 + $0x7] ss:$8 sm:$0xf0] }
0x15dd   :  { %v1005_v0 = vpack.c.bf16 %v987_v58, %v983_v57  ;;  %v999_v5 = vor.u32 %v998_v2, %v997_v6  ;;  %v1003_v7 = vor.u32 %v1002_v1, %v1001_v3 }
0x15de   :  { %1241 = vmatprep.mubr.msk.bf16.mxu1 %vm172_vm6, %v1004_v61  ;;  %v1006_v4 = vpack.c.bf16 %v995_v63, %v991_v62 }
0x15df   :  { %1242 = vmatmul.mubr.msk.bf16.vlgmr.msra.gmra.mxu1 %vm172_vm6, %v1005_v0  ;;  %v1007_v8 = vpack.c.bf16 %v1003_v7, %v999_v5 }
0x15e0   :  { %1245 = vmatprep.mubr.msk.bf16.mxu1 %vm172_vm6, %v1006_v4 }
0x15e7   :  { %1246 = vmatmul.mubr.msk.bf16.gmra.mxu1 %vm172_vm6, %v1007_v8 }
0x169f   :  { %v1243_v10 = vpop.f32.mrf.mxu1 }
0x16a0   :  { %v1078_v11 = vadd.f32 %v1243_v10, %v1130_v9 }
0x16a1   :  { %v1069_v12 = vpop.f32.mrf.mxu1 }
0x16a2   :  { %1102 = vst [vmem:[%s1544_s6 + $0x10] sm:$0xff] %v1078_v11  ;;  %v1070_v13 = vadd.f32 %v1130_v9, %v1069_v12 }
0x16a3   :  { %v1244_v14 = vpop.f32.mrf.mxu1 }
0x16a4   :  { %1100 = vst [vmem:[%s1544_s6] sm:$0xff] %v1070_v13  ;;  %v1081_v15 = vadd.f32 %v1244_v14, %v1130_v9 }
0x16a5   :  { %v1072_v16 = vpop.f32.mrf.mxu1 }
0x16a6   :  { %1103 = vst [vmem:[%s1544_s6 + $0x18] sm:$0xff] %v1081_v15  ;;  %v1073_v17 = vadd.f32 %v1130_v9, %v1072_v16 }
0x16a7   :  { %v1247_v18 = vpop.f32.mrf.mxu1 }
0x16a8   :  { %1101 = vst [vmem:[%s1544_s6 + $0x8] sm:$0xff] %v1073_v17  ;;  %v1094_v19 = vadd.f32 %v1247_v18, %v1130_v9 }
0x16a9   :  { %v1085_v20 = vpop.f32.mrf.mxu1 }
0x16aa   :  { %1106 = vst [vmem:[%s1544_s6 + $0x30] sm:$0xff] %v1094_v19  ;;  %v1086_v21 = vadd.f32 %v1130_v9, %v1085_v20 }
0x16ab   :  { %v1248_v22 = vpop.f32.mrf.mxu1 }
0x16ac   :  { %1104 = vst [vmem:[%s1544_s6 + $0x20] sm:$0xff] %v1086_v21  ;;  %v1097_v23 = vadd.f32 %v1248_v22, %v1130_v9 }
0x16ad   :  { %v1088_v24 = vpop.f32.mrf.mxu1 }
0x16ae   :  { %1107 = vst [vmem:[%s1544_s6 + $0x38] sm:$0xff] %v1097_v23  ;;  %v1089_v25 = vadd.f32 %v1130_v9, %v1088_v24 }
0x16b0   :  { %1105 = vst [vmem:[%s1544_s6 + $0x28] sm:$0xff] %v1089_v25 }

</bundles_post_ra>
